<compile_context>
chip_gen: v6e
topology: v6e:2x2x1
jax: 0.10.0
libtpu: 0.0.40
codegen_flags: <defaults>
</compile_context>

<pallas_src>
import jax
import jax.numpy as jnp
from jax import lax
from jax.experimental import pallas as pl
from jax.experimental.pallas import tpu as pltpu


def _round_up(x, m):
    return ((x + m - 1) // m) * m


def hill_forward_kernel(probe_ref, gallery_ref, s_ref, out_ref):
    # probe_ref:   (TB, Fp)  probe tile
    # gallery_ref: (TG, Fp)  gallery tile
    # s_ref:       (Fp, Fp)  symmetrized metric S = M + M^T (constant block index)
    # out_ref:     (TB, TG)  score tile (lane-dense)
    p = probe_ref[...]
    g = gallery_ref[...]
    s = s_ref[...]

    ps = jnp.dot(p, s, preferred_element_type=jnp.float32)      # (TB, Fp)  MXU
    gs = jnp.dot(g, s, preferred_element_type=jnp.float32)      # (TG, Fp)  MXU

    # cross[b, g] = p_b^T S g_g : contract the last (feature) dim of both operands.
    cross = lax.dot_general(
        ps, g, dimension_numbers=(((1,), (1,)), ((), ())),
        preferred_element_type=jnp.float32)                     # (TB, TG)  MXU

    pq = 0.5 * jnp.sum(ps * p, axis=1, keepdims=True)           # (TB, 1)
    gq = 0.5 * jnp.sum(gs * g, axis=1)[None, :]                 # (1, TG)

    # score = -(pq - cross + gq)
    out_ref[...] = cross - pq - gq


def hill_forward(probe_fea, mean_features, mlayer, *, tb=None, tg=None):
    """f_scores[b, g] = -(probe[b]-gallery[g])^T M (probe[b]-gallery[g])."""
    B, F = probe_fea.shape
    G, Fg = mean_features.shape
    assert Fg == F and mlayer.shape == (F, F)

    # Symmetrize once in the wrapper (one O(F^2) op); this keeps the kernel correct
    # for arbitrary (even non-symmetric) M while saving a full matmul per tile.
    s_mat = (mlayer + mlayer.T).astype(jnp.float32)

    # Tile sizes: probe tiles fill sublanes (>=8 rows), gallery tiles keep the
    # output lane-dense (multiple of 128 columns). Feature dim padded to 128.
    Fp = _round_up(F, 128)
    TB = tb if tb is not None else min(128, _round_up(B, 8))
    TG = tg if tg is not None else min(512, _round_up(G, 128))
    Bp = _round_up(B, TB)
    Gp = _round_up(G, TG)

    # Zero padding is exact: padded feature columns contribute 0 to every term,
    # and padded probe/gallery rows are sliced off at the end.
    p_pad = jnp.pad(probe_fea.astype(jnp.float32), ((0, Bp - B), (0, Fp - F)))
    g_pad = jnp.pad(mean_features.astype(jnp.float32), ((0, Gp - G), (0, Fp - F)))
    s_pad = jnp.pad(s_mat, ((0, Fp - F), (0, Fp - F)))

    nbt, ngt = Bp // TB, Gp // TG

    flops = nbt * ngt * (2 * TB * Fp * Fp + 2 * TG * Fp * Fp + 2 * TB * TG * Fp)
    bytes_accessed = 4 * (Bp * Fp * ngt + Gp * Fp * nbt + Fp * Fp + Bp * Gp)
    cost = pl.CostEstimate(flops=flops, transcendentals=0,
                           bytes_accessed=bytes_accessed)

    # VMEM plan: double-buffered probe/gallery/output tiles + resident S.
    # TODO(synk): for very large F (F*F*4 approaching the 64 MiB v7x VMEM budget),
    # add a trailing "arbitrary" K-reduction grid axis over F with a VMEM accumulator.
    vmem_need = 4 * (2 * TB * Fp + 2 * TG * Fp + 2 * TB * TG + 2 * Fp * Fp) + (4 << 20)
    vmem_limit = int(min(max(vmem_need, 32 << 20), 64 << 20))

    out = pl.pallas_call(
        hill_forward_kernel,
        out_shape=jax.ShapeDtypeStruct((Bp, Gp), jnp.float32),
        grid_spec=pltpu.PrefetchScalarGridSpec(
            num_scalar_prefetch=0,
            grid=(nbt, ngt),
            in_specs=[
                pl.BlockSpec((TB, Fp), lambda i, j: (i, 0)),   # probe tile i
                pl.BlockSpec((TG, Fp), lambda i, j: (j, 0)),   # gallery tile j
                pl.BlockSpec((Fp, Fp), lambda i, j: (0, 0)),   # S (resident)
            ],
            out_specs=pl.BlockSpec((TB, TG), lambda i, j: (i, j)),
        ),
        compiler_params=pltpu.CompilerParams(
            dimension_semantics=("parallel", "parallel"),
            vmem_limit_bytes=vmem_limit),
        cost_estimate=cost,
    )(p_pad, g_pad, s_pad)

    return out[:B, :G]


def make_hill_params(n_feature, train_gsize):
    """Deterministic parameter/buffer setup mirroring HillModel.__init__."""
    mlayer = jnp.eye(n_feature, dtype=jnp.float32)
    # alphap / alphan are not used in forward(), but built for fidelity.
    i = jnp.arange(train_gsize, dtype=jnp.float32)
    alphap = jnp.cumsum(jnp.where(i == 0, 1.0, 1.0 / (1.0 + i)))
    alphan = (train_gsize - i) / (train_gsize - 1)
    return mlayer, alphap, alphan


# TODO(synk): get_rank_list / humanSelectPositive / humanSelectNegative are stateful,
# host-driven rank-1 metric updates outside forward(); not implemented as kernels.


if __name__ == "__main__":
    # Small shapes consistent with forward(): probe_fea [B, F], gallery [G, F].
    B, F, G = 2, 32, 8
    train_gsize = G

    key = jax.random.PRNGKey(0)
    k1, k2 = jax.random.split(key)
    probe_fea = jax.random.normal(k1, (B, F), dtype=jnp.float32)
    mean_features = jax.random.normal(k2, (G, F), dtype=jnp.float32)
    probe_label = jnp.zeros((B,), dtype=jnp.int32)  # unused by the forward math

    mlayer, alphap, alphan = make_hill_params(F, train_gsize)

    f_scores = hill_forward(probe_fea, mean_features, mlayer)
    f_scores = jax.block_until_ready(f_scores)

    # Reference check in plain JAX (same math as the PyTorch per-probe loop).
    diff = probe_fea[:, None, :] - mean_features[None, :, :]       # (B, G, F)
    ref = -jnp.sum((diff @ mlayer) * diff, axis=-1)                # (B, G)

    assert f_scores.shape == (B, G)
    assert jnp.allclose(f_scores, ref, atol=1e-3, rtol=1e-3), (
        float(jnp.max(jnp.abs(f_scores - ref))))

    print("KERNEL_OK")
</pallas_src>

<mosaic_0001>
module attributes {stable_mosaic.version = 11 : i64} {
  func.func @hill_forward_kernel(%arg0: i32, %arg1: i32, %arg2: memref<8x128xf32, #tpu.memory_space<vmem>>, %arg3: memref<128x128xf32, #tpu.memory_space<vmem>>, %arg4: memref<128x128xf32, #tpu.memory_space<vmem>>, %arg5: memref<8x128xf32, #tpu.memory_space<vmem>>) attributes {dimension_semantics = [#tpu.dimension_semantics<parallel>, #tpu.dimension_semantics<parallel>], iteration_bounds = array<i64: 1, 1>, scalar_prefetch = 0 : i64, scratch_operands = 0 : i64, tpu.core_type = #tpu.core_type<tc>, window_params = [{transform_indices = @transform_0, window_bounds = array<i64: 8, 128>}, {transform_indices = @transform_1, window_bounds = array<i64: 128, 128>}, {pipeline_mode = #tpu.pipeline_mode<synchronous>, transform_indices = @transform_2, window_bounds = array<i64: 128, 128>}, {transform_indices = @transform_3, window_bounds = array<i64: 8, 128>}]} {
    %c0 = arith.constant 0 : index
    %c0_0 = arith.constant 0 : index
    %0 = vector.load %arg2[%c0, %c0_0] : memref<8x128xf32, #tpu.memory_space<vmem>>, vector<8x128xf32>
    %c0_1 = arith.constant 0 : index
    %c0_2 = arith.constant 0 : index
    %1 = vector.load %arg3[%c0_1, %c0_2] : memref<128x128xf32, #tpu.memory_space<vmem>>, vector<128x128xf32>
    %c0_3 = arith.constant 0 : index
    %c0_4 = arith.constant 0 : index
    %2 = vector.load %arg4[%c0_3, %c0_4] : memref<128x128xf32, #tpu.memory_space<vmem>>, vector<128x128xf32>
    %cst = arith.constant dense<0.000000e+00> : vector<8x128xf32>
    %3 = tpu.matmul %0, %2, %cst {dimension_numbers = #tpu.dot_dimension_numbers<[1], [0], [0], [1], [0, 0, 1, 1], [], []>} : vector<8x128xf32>, vector<128x128xf32>, vector<8x128xf32> -> vector<8x128xf32>
    %cst_5 = arith.constant dense<0.000000e+00> : vector<128x128xf32>
    %4 = tpu.matmul %1, %2, %cst_5 {dimension_numbers = #tpu.dot_dimension_numbers<[1], [0], [0], [1], [0, 0, 1, 1], [], []>} : vector<128x128xf32>, vector<128x128xf32>, vector<128x128xf32> -> vector<128x128xf32>
    %cst_6 = arith.constant dense<0.000000e+00> : vector<8x128xf32>
    %5 = tpu.matmul %3, %1, %cst_6 {dimension_numbers = #tpu.dot_dimension_numbers<[1], [1], [0], [0], [0, 0, 1, 0], [], []>} : vector<8x128xf32>, vector<128x128xf32>, vector<8x128xf32> -> vector<8x128xf32>
    %6 = arith.mulf %3, %0 : vector<8x128xf32>
    %cst_7 = arith.constant dense<0.000000e+00> : vector<8xf32>
    %7 = vector.multi_reduction <add>, %6, %cst_7 [1] : vector<8x128xf32> to vector<8xf32>
    %8 = vector.shape_cast %7 : vector<8xf32> to vector<8x1xf32>
    %cst_8 = arith.constant 5.000000e-01 : f32
    %9 = vector.broadcast %cst_8 : f32 to vector<8x1xf32>
    %10 = arith.mulf %9, %8 : vector<8x1xf32>
    %11 = arith.mulf %4, %1 : vector<128x128xf32>
    %cst_9 = arith.constant dense<0.000000e+00> : vector<128xf32>
    %12 = vector.multi_reduction <add>, %11, %cst_9 [1] : vector<128x128xf32> to vector<128xf32>
    %13 = vector.shape_cast %12 : vector<128xf32> to vector<1x128xf32>
    %cst_10 = arith.constant 5.000000e-01 : f32
    %14 = vector.broadcast %cst_10 : f32 to vector<1x128xf32>
    %15 = arith.mulf %14, %13 : vector<1x128xf32>
    %16 = vector.broadcast %10 : vector<8x1xf32> to vector<8x128xf32>
    %17 = arith.subf %5, %16 : vector<8x128xf32>
    %18 = vector.broadcast %15 : vector<1x128xf32> to vector<8x128xf32>
    %19 = arith.subf %17, %18 : vector<8x128xf32>
    %c0_11 = arith.constant 0 : index
    %c0_12 = arith.constant 0 : index
    %20 = vector.load %arg5[%c0_11, %c0_12] : memref<8x128xf32, #tpu.memory_space<vmem>>, vector<8x128xf32>
    tpu.vector_store %arg5[%c0_11, %c0_12], %19 {strides = array<i32>} : memref<8x128xf32, #tpu.memory_space<vmem>>, vector<8x128xf32>,
    return
  }
  func.func @transform_0(%arg0: i32, %arg1: i32) -> (i32, i32) {
    %c0_i32 = arith.constant 0 : i32
    %c0_i32_0 = arith.constant 0 : i32
    return %arg0, %c0_i32 : i32, i32
  }
  func.func @transform_1(%arg0: i32, %arg1: i32) -> (i32, i32) {
    %c0_i32 = arith.constant 0 : i32
    %c0_i32_0 = arith.constant 0 : i32
    return %arg1, %c0_i32 : i32, i32
  }
  func.func @transform_2(%arg0: i32, %arg1: i32) -> (i32, i32) {
    %c0_i32 = arith.constant 0 : i32
    %c0_i32_0 = arith.constant 0 : i32
    %c0_i32_1 = arith.constant 0 : i32
    return %c0_i32, %c0_i32_0 : i32, i32
  }
  func.func @transform_3(%arg0: i32, %arg1: i32) -> (i32, i32) {
    %c0_i32 = arith.constant 0 : i32
    return %arg0, %arg1 : i32, i32
  }
}

</mosaic_0001>

<bundles_post_ra>
// kernel: tpu_custom_call.1
= control target key start
LH: loop header
LB: loop body
LE: loop exit
PB: predicated region body
PF: predicated region fallthrough
CT: control target
= control target key end

     0   :  { %8 = vsyncpa [#allocation3], 0  ;;  %s1139_s0 = inlined_call_operand.hbm [shape: f32[8,128], index: 0, kind: input, shape index: {}]   ;;  %s1140_s1 = inlined_call_operand.hbm [shape: f32[128,128], index: 1, kind: input, shape index: {}]   ;;  %s1141_s2 = inlined_call_operand.hbm [shape: f32[128,128], index: 2, kind: input, shape index: {}]   ;;  %s1142_s3 = inlined_call_operand.hbm [shape: f32[8,128], index: 3, kind: output, shape index: {}]  }
   0x1   :  { %9 = vsyncpa [#allocation6], 0 }
   0x2   :  { %10 = vsyncpa [#allocation4], 0  ;;  %s885_s12 = smov [#allocation5]  }
   0x3   :  { %s26_s13 = sshll.u32 %s885_s12, 4  ;;  %s27_s13 = int_to_ptr.vmem [resolvable:$true] %s26_s13 }
   0x4   :  { %s807_s14 = scalar_lea.vmem %s27_s13, 2048  ;;  %p812_p1 = scmp.lt.s32.totalorder %s27_s13, %s27_s13 }
   0x5   :  { %p808_p0 = scmp.ne.s32.totalorder %s27_s13, %s807_s14  ;;  %p813_p2 = scmp.lt.s32.totalorder %s807_s14, %s807_s14 }
   0x7   :  { %p814_p3 = por %p813_p2, %p812_p1 }
   0x9   :  { %p815_p4 = pnand %p814_p3, %p808_p0 }
   0xb   :  { %818 = shalt.err (!%p815_p4)
}
   0xc   :  { %s886_s15 = smov 128   ;;  %s887_s16 = smov 8  }
   0xd   :  { %32 = dma.hbm_to_vmem [thread:$0]  %s1140_s1, 2048, %s27_s13, [#allocation6], %s886_s15, %s886_s15, %s887_s16  }
   0xe   :  { %s888_s19 = smov [#allocation2]   ;;  %s889_s21 = smov [#allocation7]  }
   0xf   :  { %s17_s20 = sshll.u32 %s888_s19, 4  ;;  %s38_s22 = sshll.u32 %s889_s21, 4  ;;  %s18_s20 = int_to_ptr.vmem [resolvable:$true] %s17_s20  ;;  %s39_s22 = int_to_ptr.vmem [resolvable:$true] %s38_s22 }
  0x10   :  { %s827_s23 = scalar_lea.vmem %s18_s20, 128  ;;  %p832_p6 = scmp.lt.s32.totalorder %s18_s20, %s18_s20 }
  0x11   :  { %p828_p5 = scmp.ne.s32.totalorder %s18_s20, %s827_s23  ;;  %p833_p7 = scmp.lt.s32.totalorder %s827_s23, %s827_s23 }
  0x13   :  { %p834_p8 = por %p833_p7, %p832_p6 }
  0x15   :  { %p835_p9 = pnand %p834_p8, %p828_p5 }
  0x17   :  { %838 = shalt.err (!%p835_p9)
}
  0x18   :  { %20 = dma.hbm_to_vmem [thread:$0]  %s1139_s0, 128, %s18_s20, [#allocation3]  }
  0x19   :  { %s847_s26 = scalar_lea.vmem %s39_s22, 2048  ;;  %p852_p11 = scmp.lt.s32.totalorder %s39_s22, %s39_s22 }
  0x1a   :  { %p848_p10 = scmp.ne.s32.totalorder %s39_s22, %s847_s26  ;;  %p853_p12 = scmp.lt.s32.totalorder %s847_s26, %s847_s26 }
  0x1c   :  { %p854_p13 = por %p853_p12, %p852_p11 }
  0x1e   :  { %p855_p0 = pnand %p854_p13, %p848_p10 }
  0x20   :  { %858 = shalt.err (!%p855_p0)
}
  0x21   :  { %44 = dma.hbm_to_vmem [thread:$0]  %s1141_s2, 2048, %s39_s22, [#allocation6], %s886_s15, %s886_s15, %s887_s16  }
  0x22   :  { %879 = dma.done.wait [#allocation3], 128  }
  0x23   :  { %880 = vsyncadd [#allocation3], 4294967168 }
  0x24   :  { %881 = dma.done.wait [#allocation6], 4096  }
  0x25   :  { %882 = vsyncadd [#allocation6], 4294963200  ;;  %v890_v0 = vmov 0.0   ;;  %vm891_vm0 = vmmov 0   ;;  %v926_v1 = vld [vmem:[#allocation7 + $0x78] sm:$0xff]  ;;  %v928_v2 = vld [vmem:[#allocation7 + $0x70] sm:$0xff] }
  0x26   :  { %665 = vmatprep.subr.mxu1 %v890_v0  ;;  %697 = vmatprep.mubr.msk.f32.mxu1 %vm891_vm0, %v890_v0  ;;  %v932_v3 = vld [vmem:[#allocation7 + $0x68] sm:$0xff]  ;;  %v936_v4 = vld [vmem:[#allocation7 + $0x60] sm:$0xff]  ;;  %v940_v5 = vld [vmem:[#allocation7 + $0x58] sm:$0xff]  ;;  %vm468_vm1 = vcmask 130112   ;;  %vm475_vm2 = vcmask 195712   ;;  %vm482_vm3 = vcmask 261312  }
  0x27   :  { %756 = vmatprep.subr.mxu0 %v890_v0  ;;  %788 = vmatprep.mubr.msk.f32.mxu0 %vm891_vm0, %v890_v0  ;;  %v944_v6 = vld [vmem:[#allocation7 + $0x50] sm:$0xff]  ;;  %v948_v7 = vld [vmem:[#allocation7 + $0x48] sm:$0xff]  ;;  %v950_v8 = vld [vmem:[#allocation5 + $0x78] sm:$0xff]  ;;  %vm489_vm4 = vcmask 326912   ;;  %vm496_vm5 = vcmask 392512   ;;  %vm503_vm6 = vcmask 458112  }
  0x28   :  { %666 = vmatpush3.msra.mxu1 %v926_v1  ;;  %757 = vmatpush3.xpose.msra.mxu0 %v950_v8  ;;  %v955_v9 = vld [vmem:[#allocation7 + $0x40] sm:$0xff]  ;;  %v960_v10 = vld [vmem:[#allocation7 + $0x38] sm:$0xff]  ;;  %v962_v11 = vld [vmem:[#allocation5 + $0x70] sm:$0xff]  ;;  %vm510_vm7 = vcmask 523712   ;;  %vm517_vm8 = vcmask 589312   ;;  %vm524_vm9 = vcmask 654912  }
  0x29   :  { %667 = vmatprep.subr.mxu1 %v890_v0  ;;  %758 = vmatprep.subr.mxu0 %v890_v0  ;;  %v967_v12 = vld [vmem:[#allocation7 + $0x30] sm:$0xff]  ;;  %v972_v13 = vld [vmem:[#allocation7 + $0x28] sm:$0xff]  ;;  %v979_v15 = vld [vmem:[#allocation7 + $0x20] sm:$0xff]  ;;  %vm531_vm10 = vcmask 720512   ;;  %vm538_vm11 = vcmask 786112   ;;  %vm545_vm12 = vcmask 851712  }
  0x2a   :  { %668 = vmatpush3.msra.mxu1 %v928_v2  ;;  %v974_v14 = vld [vmem:[#allocation5 + $0x68] sm:$0xff]  ;;  %v984_v16 = vld [vmem:[#allocation7 + $0x18] sm:$0xff]  ;;  %v986_v17 = vld [vmem:[#allocation5 + $0x60] sm:$0xff]  ;;  %vm552_vm13 = vcmask 917312   ;;  %vm559_vm14 = vcmask 982912   ;;  %vm566_vm15 = vcmask 1048512  }
  0x2b   :  { %669 = vmatprep.subr.mxu1 %v890_v0  ;;  %v991_v18 = vld [vmem:[#allocation7 + $0x10] sm:$0xff]  ;;  %v996_v19 = vld [vmem:[#allocation7 + $0x8] sm:$0xff]  ;;  %v998_v20 = vld [vmem:[#allocation5 + $0x58] sm:$0xff]  ;;  %s892_s0 = smov [#allocation8]  }
  0x2c   :  { %670 = vmatpush3.msra.mxu1 %v932_v3  ;;  %759 = vmatpush3.xpose.msra.mxu0 %v962_v11  ;;  %v1003_v21 = vld [vmem:[#allocation7] sm:$0xff]  ;;  %v1007_v22 = vld [vmem:[#allocation2] sm:$0xff]  ;;  %v1012_v24 = vld [vmem:[#allocation5 + $0x50] sm:$0xff]  ;;  %s589_s2 = sshll.u32 %s892_s0, 4  ;;  %s590_s2 = int_to_ptr.vmem [resolvable:$true] %s589_s2 }
  0x2d   :  { %671 = vmatprep.subr.mxu1 %v890_v0  ;;  %760 = vmatprep.subr.mxu0 %v890_v0  ;;  %v1010_v23 = vld [vmem:[#allocation5] sm:$0xff]  ;;  %v1021_v25 = vld [vmem:[#allocation5 + $0x48] sm:$0xff]  ;;  %v1038_v27 = vld [vmem:[#allocation5 + $0x38] sm:$0xff]  ;;  %s859_s28 = scalar_lea.vmem %s590_s2, 128  ;;  %p864_p2 = scmp.lt.s32.totalorder %s590_s2, %s590_s2 }
  0x2e   :  { %672 = vmatpush3.msra.mxu1 %v936_v4  ;;  %v1030_v26 = vld [vmem:[#allocation5 + $0x40] sm:$0xff]  ;;  %v1046_v28 = vld [vmem:[#allocation5 + $0x30] sm:$0xff]  ;;  %v1054_v29 = vld [vmem:[#allocation5 + $0x28] sm:$0xff]  ;;  %p860_p1 = scmp.ne.s32.totalorder %s590_s2, %s859_s28  ;;  %p865_p3 = scmp.lt.s32.totalorder %s859_s28, %s859_s28 }
  0x2f   :  { %673 = vmatprep.subr.mxu1 %v890_v0  ;;  %v59_v30 = vld [vmem:[#allocation5 + $0x20] sm:$0xff]  ;;  %v58_v31 = vld [vmem:[#allocation5 + $0x18] sm:$0xff]  ;;  %v56_v32 = vld [vmem:[#allocation5 + $0x8] sm:$0xff] }
  0x30   :  { %674 = vmatpush3.msra.mxu1 %v940_v5  ;;  %761 = vmatpush3.xpose.msra.mxu0 %v974_v14  ;;  %v57_v33 = vld [vmem:[#allocation5 + $0x10] sm:$0xff]  ;;  %p866_p4 = por %p865_p3, %p864_p2 }
  0x31   :  { %675 = vmatprep.subr.mxu1 %v890_v0  ;;  %762 = vmatprep.subr.mxu0 %v890_v0 }
  0x32   :  { %676 = vmatpush3.msra.mxu1 %v944_v6  ;;  %p867_p5 = pnand %p866_p4, %p860_p1 }
  0x33   :  { %677 = vmatprep.subr.mxu1 %v890_v0 }
  0x34   :  { %678 = vmatpush3.msra.mxu1 %v948_v7  ;;  %763 = vmatpush3.xpose.msra.mxu0 %v986_v17 }
  0x35   :  { %679 = vmatprep.subr.mxu1 %v890_v0  ;;  %764 = vmatprep.subr.mxu0 %v890_v0 }
  0x36   :  { %680 = vmatpush3.msra.mxu1 %v955_v9 }
  0x37   :  { %681 = vmatprep.subr.mxu1 %v890_v0 }
  0x38   :  { %682 = vmatpush3.msra.mxu1 %v960_v10  ;;  %765 = vmatpush3.xpose.msra.mxu0 %v998_v20 }
  0x39   :  { %683 = vmatprep.subr.mxu1 %v890_v0  ;;  %766 = vmatprep.subr.mxu0 %v890_v0 }
  0x3a   :  { %684 = vmatpush3.msra.mxu1 %v967_v12 }
  0x3b   :  { %685 = vmatprep.subr.mxu1 %v890_v0 }
  0x3c   :  { %686 = vmatpush3.msra.mxu1 %v972_v13  ;;  %767 = vmatpush3.xpose.msra.mxu0 %v1012_v24 }
  0x3d   :  { %687 = vmatprep.subr.mxu1 %v890_v0  ;;  %768 = vmatprep.subr.mxu0 %v890_v0 }
  0x3e   :  { %688 = vmatpush3.msra.mxu1 %v979_v15 }
  0x3f   :  { %689 = vmatprep.subr.mxu1 %v890_v0 }
  0x40   :  { %690 = vmatpush3.msra.mxu1 %v984_v16  ;;  %769 = vmatpush3.xpose.msra.mxu0 %v1021_v25 }
  0x41   :  { %691 = vmatprep.subr.mxu1 %v890_v0  ;;  %770 = vmatprep.subr.mxu0 %v890_v0 }
  0x42   :  { %692 = vmatpush3.msra.mxu1 %v991_v18 }
  0x43   :  { %693 = vmatprep.subr.mxu1 %v890_v0 }
  0x44   :  { %694 = vmatpush3.msra.mxu1 %v996_v19  ;;  %771 = vmatpush3.xpose.msra.mxu0 %v1030_v26 }
  0x45   :  { %695 = vmatprep.subr.mxu1 %v890_v0  ;;  %772 = vmatprep.subr.mxu0 %v890_v0 }
  0x46   :  { %696 = vmatpush3.msra.mxu1 %v1003_v21 }
  0x47   :  { %698 = vmatmul.mubr.f32.vlgmr.msra.gmra.mxu1 %v1007_v22  ;;  %700 = vmatprep.subr.mxu1 %v926_v1 }
  0x48   :  { %701 = vmatpush3.msra.mxu1 %v926_v1  ;;  %732 = vmatprep.mubr.f32.mxu1 %v1010_v23 }
  0x49   :  { %702 = vmatprep.subr.mxu1 %v928_v2  ;;  %773 = vmatpush3.xpose.msra.mxu0 %v1038_v27 }
  0x4a   :  { %703 = vmatpush3.msra.mxu1 %v928_v2  ;;  %774 = vmatprep.subr.mxu0 %v890_v0 }
  0x4b   :  { %704 = vmatprep.subr.mxu1 %v932_v3 }
  0x4c   :  { %705 = vmatpush3.msra.mxu1 %v932_v3 }
  0x4d   :  { %706 = vmatprep.subr.mxu1 %v936_v4  ;;  %775 = vmatpush3.xpose.msra.mxu0 %v1046_v28 }
  0x4e   :  { %707 = vmatpush3.msra.mxu1 %v936_v4  ;;  %776 = vmatprep.subr.mxu0 %v890_v0 }
  0x4f   :  { %708 = vmatprep.subr.mxu1 %v940_v5 }
  0x50   :  { %709 = vmatpush3.msra.mxu1 %v940_v5  ;;  %v457_v5 = vlaneseq }
  0x51   :  { %710 = vmatprep.subr.mxu1 %v944_v6  ;;  %777 = vmatpush3.xpose.msra.mxu0 %v1054_v29 }
  0x52   :  { %711 = vmatpush3.msra.mxu1 %v944_v6  ;;  %778 = vmatprep.subr.mxu0 %v890_v0  ;;  %v1100_v6 = vand.u32 127, %v457_v5 }
  0x53   :  { %712 = vmatprep.subr.mxu1 %v948_v7 }
  0x54   :  { %713 = vmatpush3.msra.mxu1 %v948_v7 }
  0x55   :  { %714 = vmatprep.subr.mxu1 %v955_v9  ;;  %779 = vmatpush3.xpose.msra.mxu0 %v59_v30 }
  0x56   :  { %715 = vmatpush3.msra.mxu1 %v955_v9  ;;  %780 = vmatprep.subr.mxu0 %v890_v0  ;;  %v1102_v9 = vshrl.u32 %v457_v5, 7  ;;  %v547_v5 = vadd.s32 4294967192, %v1100_v6 }
  0x57   :  { %716 = vmatprep.subr.mxu1 %v960_v10 }
  0x58   :  { %717 = vmatpush3.msra.mxu1 %v960_v10  ;;  %v463_v10 = vadd.s32 4294967288, %v1100_v6 }
  0x59   :  { %718 = vmatprep.subr.mxu1 %v967_v12  ;;  %781 = vmatpush3.xpose.msra.mxu0 %v58_v31 }
  0x5a   :  { %719 = vmatpush3.msra.mxu1 %v967_v12  ;;  %782 = vmatprep.subr.mxu0 %v890_v0  ;;  %v470_v12 = vadd.s32 4294967280, %v1100_v6 }
  0x5b   :  { %720 = vmatprep.subr.mxu1 %v972_v13 }
  0x5c   :  { %721 = vmatpush3.msra.mxu1 %v972_v13 }
  0x5d   :  { %722 = vmatprep.subr.mxu1 %v979_v15  ;;  %783 = vmatpush3.xpose.msra.mxu0 %v57_v33 }
  0x5e   :  { %723 = vmatpush3.msra.mxu1 %v979_v15  ;;  %784 = vmatprep.subr.mxu0 %v890_v0 }
  0x5f   :  { %724 = vmatprep.subr.mxu1 %v984_v16 }
  0x60   :  { %725 = vmatpush3.msra.mxu1 %v984_v16  ;;  %v484_v16 = vadd.s32 4294967264, %v1100_v6 }
  0x61   :  { %726 = vmatprep.subr.mxu1 %v991_v18  ;;  %785 = vmatpush3.xpose.msra.mxu0 %v56_v32 }
  0x62   :  { %727 = vmatpush3.msra.mxu1 %v991_v18  ;;  %786 = vmatprep.subr.mxu0 %v890_v0 }
  0x63   :  { %728 = vmatprep.subr.mxu1 %v996_v19 }
  0x64   :  { %729 = vmatpush3.msra.mxu1 %v996_v19  ;;  %v473_v19 = vsub.s32 %v470_v12, %v1102_v9 }
  0x65   :  { %730 = vmatprep.subr.mxu1 %v1003_v21  ;;  %787 = vmatpush3.xpose.msra.mxu0 %v1010_v23 }
  0x66   :  { %731 = vmatpush3.msra.mxu1 %v1003_v21 }
  0x67   :  { %733 = vmatmul.mubr.f32.vlgmr.msra.gmra.mxu1 %v56_v32 }
  0x68   :  { %735 = vmatprep.mubr.f32.mxu1 %v57_v33 }
  0x6b   :  { %736 = vmatmul.mubr.f32.gmra.mxu1 %v58_v31 }
  0x6c   :  { %738 = vmatprep.mubr.f32.mxu1 %v59_v30 }
  0x6f   :  { %739 = vmatmul.mubr.f32.gmra.mxu1 %v1054_v29 }
  0x70   :  { %741 = vmatprep.mubr.f32.mxu1 %v1046_v28 }
  0x73   :  { %742 = vmatmul.mubr.f32.gmra.mxu1 %v1038_v27 }
  0x74   :  { %744 = vmatprep.mubr.f32.mxu1 %v1030_v26 }
  0x77   :  { %745 = vmatmul.mubr.f32.gmra.mxu1 %v1021_v25 }
  0x78   :  { %747 = vmatprep.mubr.f32.mxu1 %v1012_v24 }
  0x7b   :  { %748 = vmatmul.mubr.f32.gmra.mxu1 %v998_v20 }
  0x7c   :  { %750 = vmatprep.mubr.f32.mxu1 %v986_v17 }
  0x7f   :  { %751 = vmatmul.mubr.f32.gmra.mxu1 %v974_v14 }
  0x80   :  { %753 = vmatprep.mubr.f32.mxu1 %v962_v11 }
  0x83   :  { %754 = vmatmul.mubr.f32.gmra.mxu1 %v950_v8 }
 0x107   :  { %v153_v34 = vpop.f32.mrf.mxu1 }
 0x108   :  { %789 = vmatmul.mubr.f32.vlgmr.msra.gmra.mxu0 %v153_v34  ;;  %v372_v4 = vmul.f32 %v153_v34, %v1007_v22 }
 0x109   :  { %v699_v35 = vpop.f32.mrf.mxu1 }
 0x127   :  { %v734_v36 = vpop.f32.mrf.mxu1 }
 0x128   :  { %v377_v37 = vmul.f32 %v734_v36, %v56_v32 }
 0x129   :  { %v223_v38 = vpop.f32.mrf.mxu1 }
 0x12a   :  { %394 = vadd.xlane.f32.xlu0 %v377_v37  ;;  %v376_v40 = vmul.f32 %v223_v38, %v1010_v23  ;;  %v512_v37 = vadd.s32 4294967232, %v1100_v6 }
 0x12b   :  { %v737_v39 = vpop.f32.mrf.mxu1 }
 0x12c   :  { %v379_v41 = vmul.f32 %v737_v39, %v58_v31 }
 0x12d   :  { %v233_v42 = vpop.f32.mrf.mxu1 }
 0x12e   :  { %392 = vadd.xlane.f32.xlu0 %v376_v40  ;;  %398 = vadd.xlane.f32.xlu1 %v379_v41  ;;  %v378_v44 = vmul.f32 %v233_v42, %v57_v33  ;;  %v505_v33 = vadd.s32 4294967240, %v1100_v6 }
 0x12f   :  { %v740_v43 = vpop.f32.mrf.mxu1 }
 0x130   :  { %v381_v48 = vmul.f32 %v740_v43, %v1054_v29 }
 0x131   :  { %v243_v45 = vpop.f32.mrf.mxu1 }
 0x132   :  { %v380_v46 = vmul.f32 %v243_v45, %v59_v30  ;;  %396 = vadd.xlane.f32.xlu1 %v378_v44  ;;  %v519_v44 = vadd.s32 4294967224, %v1100_v6 }
 0x133   :  { %v743_v47 = vpop.f32.mrf.mxu1 }
 0x134   :  { %400 = vadd.xlane.f32.xlu0 %v380_v46  ;;  %v383_v52 = vmul.f32 %v743_v47, %v1038_v27  ;;  %v498_v27 = vadd.s32 4294967248, %v1100_v6 }
 0x135   :  { %v253_v49 = vpop.f32.mrf.mxu1 }
 0x136   :  { %v382_v50 = vmul.f32 %v253_v49, %v1046_v28  ;;  %402 = vadd.xlane.f32.xlu1 %v381_v48  ;;  %v501_v41 = vsub.s32 %v498_v27, %v1102_v9  ;;  %v508_v48 = vsub.s32 %v505_v33, %v1102_v9 }
 0x137   :  { %v746_v51 = vpop.f32.mrf.mxu1 }
 0x138   :  { %404 = vadd.xlane.f32.xlu0 %v382_v50  ;;  %v385_v56 = vmul.f32 %v746_v51, %v1021_v25  ;;  %v515_v50 = vsub.s32 %v512_v37, %v1102_v9 }
 0x139   :  { %v263_v53 = vpop.f32.mrf.mxu1 }
 0x13a   :  { %v384_v54 = vmul.f32 %v263_v53, %v1030_v26  ;;  %406 = vadd.xlane.f32.xlu1 %v383_v52  ;;  %v487_v26 = vsub.s32 %v484_v16, %v1102_v9 }
 0x13b   :  { %v749_v55 = vpop.f32.mrf.mxu1 }
 0x13c   :  { %408 = vadd.xlane.f32.xlu0 %v384_v54  ;;  %v387_v60 = vmul.f32 %v749_v55, %v998_v20  ;;  %v491_v20 = vadd.s32 4294967256, %v1100_v6  ;;  %v526_v54 = vadd.s32 4294967216, %v1100_v6 }
 0x13d   :  { %v273_v57 = vpop.f32.mrf.mxu1 }
 0x13e   :  { %v386_v58 = vmul.f32 %v273_v57, %v1012_v24  ;;  %410 = vadd.xlane.f32.xlu1 %v385_v56  ;;  %v494_v32 = vsub.s32 %v491_v20, %v1102_v9  ;;  %v522_v56 = vsub.s32 %v519_v44, %v1102_v9  ;;  %v550_v20 = vsub.s32 %v547_v5, %v1102_v9 }
 0x13f   :  { %v752_v59 = vpop.f32.mrf.mxu1 }
 0x140   :  { %412 = vadd.xlane.f32.xlu0 %v386_v58  ;;  %v389_v0 = vmul.f32 %v752_v59, %v974_v14 }
 0x141   :  { %v283_v61 = vpop.f32.mrf.mxu1 }
 0x142   :  { %v388_v62 = vmul.f32 %v283_v61, %v986_v17  ;;  %414 = vadd.xlane.f32.xlu1 %v387_v60  ;;  %v466_v17 = vsub.s32 %v463_v10, %v1102_v9  ;;  %v533_v60 = vadd.s32 4294967208, %v1100_v6 }
 0x143   :  { %v755_v63 = vpop.f32.mrf.mxu1 }
 0x144   :  { %416 = vadd.xlane.f32.xlu0 %v388_v62  ;;  %v391_v3 = vmul.f32 %v755_v63, %v950_v8  ;;  %v477_v8 = vadd.s32 4294967272, %v1100_v6  ;;  %v540_v62 = vadd.s32 4294967200, %v1100_v6 }
 0x145   :  { %v293_v1 = vpop.f32.mrf.mxu1 }
 0x146   :  { %v390_v2 = vmul.f32 %v293_v1, %v962_v11  ;;  %418 = vadd.xlane.f32.xlu1 %v389_v0  ;;  %v461_v11 = vsub.s32 %v1100_v6, %v1102_v9  ;;  %v480_v22 = vsub.s32 %v477_v8, %v1102_v9 }
 0x148   :  { %420 = vadd.xlane.f32.xlu0 %v390_v2 }
 0x14a   :  { %422 = vadd.xlane.f32.xlu1 %v391_v3  ;;  %v529_v3 = vsub.s32 %v526_v54, %v1102_v9 }
 0x14c   :  { %373 = vadd.xlane.f32.xlu0 %v372_v4 }
 0x1b3   :  { %v395_v7 = vpop.xlane.xlu0 %394 }
 0x1b4   :  { %v425_v18 = vmul.f32 0.5, %v395_v7 }
 0x1b6   :  { %v467_v28 = vrot.slane %v425_v18, %v466_v17  ;;  %v554_v18 = vadd.s32 4294967184, %v1100_v6 }
 0x1b7   :  { %v393_v13 = vpop.xlane.xlu0 %392  ;;  %v399_v14 = vpop.xlane.xlu1 %398 }
 0x1b8   :  { %v424_v15 = vmul.f32 0.5, %v393_v13  ;;  %v427_v23 = vmul.f32 0.5, %v399_v14  ;;  %v536_v13 = vsub.s32 %v533_v60, %v1102_v9  ;;  %v543_v14 = vsub.s32 %v540_v62, %v1102_v9 }
 0x1ba   :  { %v462_v21 = vrot.slane %v424_v15, %v461_v11  ;;  %v481_v35 = vrot.slane %v427_v23, %v480_v22 }
 0x1bb   :  { %v397_v24 = vpop.xlane.xlu1 %396 }
 0x1bc   :  { %v426_v25 = vmul.f32 0.5, %v397_v24  ;;  %v469_v34 = vsel %vm468_vm1, %v467_v28, %v462_v21  ;;  %v561_v24 = vadd.s32 4294967176, %v1100_v6 }
 0x1bd   :  { %v401_v29 = vpop.xlane.xlu0 %400 }
 0x1be   :  { %v474_v30 = vrot.slane %v426_v25, %v473_v19  ;;  %v428_v31 = vmul.f32 0.5, %v401_v29  ;;  %v557_v29 = vsub.s32 %v554_v18, %v1102_v9 }
 0x1bf   :  { %v403_v36 = vpop.xlane.xlu1 %402 }
 0x1c0   :  { %v476_v38 = vsel %vm475_vm2, %v474_v30, %v469_v34  ;;  %v488_v39 = vrot.slane %v428_v31, %v487_v26  ;;  %v429_v40 = vmul.f32 0.5, %v403_v36  ;;  %v564_v34 = vsub.s32 %v561_v24, %v1102_v9 }
 0x1c1   :  { %v483_v42 = vsel %vm482_vm3, %v481_v35, %v476_v38  ;;  %v405_v43 = vpop.xlane.xlu0 %404 }
 0x1c2   :  { %v490_v45 = vsel %vm489_vm4, %v488_v39, %v483_v42  ;;  %v495_v46 = vrot.slane %v429_v40, %v494_v32  ;;  %v430_v47 = vmul.f32 0.5, %v405_v43 }
 0x1c3   :  { %v407_v49 = vpop.xlane.xlu1 %406 }
 0x1c4   :  { %v497_v51 = vsel %vm496_vm5, %v495_v46, %v490_v45  ;;  %v502_v52 = vrot.slane %v430_v47, %v501_v41  ;;  %v431_v53 = vmul.f32 0.5, %v407_v49 }
 0x1c5   :  { %v409_v55 = vpop.xlane.xlu0 %408 }
 0x1c6   :  { %v504_v57 = vsel %vm503_vm6, %v502_v52, %v497_v51  ;;  %v509_v58 = vrot.slane %v431_v53, %v508_v48  ;;  %v432_v59 = vmul.f32 0.5, %v409_v55 }
 0x1c7   :  { %v411_v61 = vpop.xlane.xlu1 %410 }
 0x1c8   :  { %v511_v63 = vsel %vm510_vm7, %v509_v58, %v504_v57  ;;  %v516_v0 = vrot.slane %v432_v59, %v515_v50  ;;  %v433_v1 = vmul.f32 0.5, %v411_v61  ;;  %v368_v2 = vpop.f32.mrf.mxu0 }
 0x1c9   :  { %v413_v4 = vpop.xlane.xlu0 %412 }
 0x1ca   :  { %v518_v7 = vsel %vm517_vm8, %v516_v0, %v511_v63  ;;  %v523_v10 = vrot.slane %v433_v1, %v522_v56  ;;  %v434_v12 = vmul.f32 0.5, %v413_v4  ;;  %v790_v11 = vpop.f32.mrf.mxu0 }
 0x1cb   :  { %v415_v8 = vpop.xlane.xlu1 %414 }
 0x1cc   :  { %v525_v15 = vsel %vm524_vm9, %v523_v10, %v518_v7  ;;  %v530_v16 = vrot.slane %v434_v12, %v529_v3  ;;  %v435_v17 = vmul.f32 0.5, %v415_v8 }
 0x1cd   :  { %v417_v19 = vpop.xlane.xlu0 %416 }
 0x1ce   :  { %v532_v21 = vsel %vm531_vm10, %v530_v16, %v525_v15  ;;  %v537_v22 = vrot.slane %v435_v17, %v536_v13  ;;  %v436_v23 = vmul.f32 0.5, %v417_v19 }
 0x1cf   :  { %v419_v25 = vpop.xlane.xlu1 %418 }
 0x1d0   :  { %v539_v26 = vsel %vm538_vm11, %v537_v22, %v532_v21  ;;  %v544_v27 = vrot.slane %v436_v23, %v543_v14  ;;  %v437_v28 = vmul.f32 0.5, %v419_v25 }
 0x1d1   :  { %v421_v30 = vpop.xlane.xlu0 %420 }
 0x1d2   :  { %v546_v31 = vsel %vm545_vm12, %v544_v27, %v539_v26  ;;  %v551_v32 = vrot.slane %v437_v28, %v550_v20  ;;  %v438_v33 = vmul.f32 0.5, %v421_v30 }
 0x1d3   :  { %v423_v35 = vpop.xlane.xlu1 %422 }
 0x1d4   :  { %v553_v36 = vsel %vm552_vm13, %v551_v32, %v546_v31  ;;  %v558_v37 = vrot.slane %v438_v33, %v557_v29  ;;  %v439_v38 = vmul.f32 0.5, %v423_v35 }
 0x1d5   :  { %v374_v6 = vpop.xlane.xlu0 %373 }
 0x1d6   :  { %v565_v39 = vrot.slane %v439_v38, %v564_v34  ;;  %v375_v40 = vmul.f32 0.5, %v374_v6  ;;  %v560_v41 = vsel %vm559_vm14, %v558_v37, %v553_v36 }
 0x1d8   :  { %v440_v42 = vsub.f32 %v368_v2, %v375_v40  ;;  %v567_v43 = vsel %vm566_vm15, %v565_v39, %v560_v41 }
 0x1da   :  { %v581_v44 = vsub.f32 %v440_v42, %v567_v43 }
 0x1dc   :  { %582 = vst [vmem:[#allocation8] sm:$0xff] %v581_v44 }
 0x1dd   :  { %870 = shalt.err (!%p867_p5)
}
 0x1de   :  { %592 = dma.vmem_to_hbm [thread:$0]  %s590_s2, 128, %s1142_s3, [#allocation4]  }
 0x1df   :  { %883 = dma.done.wait [#allocation4], 128  }
 0x1e0   :  { %884 = vsyncadd [#allocation4], 4294967168 }
 0x1e1   :  { %596 = vsyncpa [#allocation3], 1 }
 0x1e2   :  { %597 = vsyncpa [#allocation6], 1 }
 0x1e3   :  { %598 = vsyncpa [#allocation4], 1 }

</bundles_post_ra>
